<compile_context>
chip_gen: v7x
topology: tpu7x:2x2x1
jax: 0.10.0
libtpu: 0.0.40
codegen_flags: <defaults>
</compile_context>

<pallas_src>
import math

import jax
import jax.numpy as jnp
from jax import lax
from jax.experimental import pallas as pl
from jax.experimental.pallas import tpu as pltpu

_INV_SQRT2 = 1.0 / math.sqrt(2.0)


def _round_up(x, m):
    return ((x + m - 1) // m) * m


# -------------------------- fused Pallas kernel -----------------------------

def _make_fused_kernel(num_steps):
    """Kernel over one TM-wide lane tile, running all `num_steps` steps.

    ref order: x0, res_1..res_n, (w1,b1,w2,b2) * n, out_1..out_n
    Shapes inside the kernel: activations (T_i, TM), weights (T_out, T_in),
    biases (T_out, 1).
    """

    def kernel(*refs):
        x0_ref = refs[0]
        res_refs = refs[1:1 + num_steps]
        p_refs = refs[1 + num_steps:1 + 5 * num_steps]
        out_refs = refs[1 + 5 * num_steps:]

        cur = x0_ref[...]  # (T0, TM); accumulation stays f32 via the dots
        for s in range(num_steps):
            w1 = p_refs[4 * s][...]
            b1 = p_refs[4 * s + 1][...]
            w2 = p_refs[4 * s + 2][...]
            b2 = p_refs[4 * s + 3][...]
            # (T_out, T_in) @ (T_in, TM) -> (T_out, TM), MXU N-dim = TM
            h = jnp.dot(w1, cur.astype(w1.dtype),
                        preferred_element_type=jnp.float32) + b1
            # exact GELU (matches torch.nn.GELU default): 0.5*h*(1+erf(h/sqrt2))
            g = 0.5 * h * (1.0 + lax.erf(h * _INV_SQRT2))
            y = jnp.dot(w2, g.astype(w2.dtype),
                        preferred_element_type=jnp.float32) + b2
            cur = res_refs[s][...].astype(jnp.float32) + y
            out_refs[s][...] = cur.astype(out_refs[s].dtype)

    return kernel


def _pick_tm(M, max_tm=2048):
    """Lane-axis tile width over the B*C rows.

    Lane blocks must be a multiple of 128 unless they cover the whole axis.
    For large M aim for ~4 tiles so a 2-TensorCore chip (v7x) can shard the
    'parallel' grid axis, while keeping tiles fat to amortize the ~0.35us
    per-grid-step overhead (matters on single-TC v5e/v6e).
    """
    if M < 256:
        return M                      # single full-extent tile
    ntiles = 2 if M < 1024 else 4
    tm = _round_up(pl.cdiv(M, ntiles), 128)
    return max(128, min(max_tm, tm))


def fused_up_sampling(x0, res_list, params, max_tm=2048):
    """Run all up-sampling steps in a single pallas_call (lane-major layout).

    x0:       (T0, M)        coarsest trend, time on sublanes, rows on lanes
    res_list: [(T_i, M)]     residuals (the finer-scale trends), i = 1..n
    params:   [(w1,b1,w2,b2)] per step; w stored (out, in), b stored (out, 1)
    returns:  [(T_i, M)]     outputs of each step
    """
    n = len(res_list)
    assert n == len(params)
    if n == 0:
        return []
    T0, M = x0.shape

    TM = _pick_tm(M, max_tm)
    grid = (pl.cdiv(M, TM),)

    col_map = lambda i: (0, i)    # tiles march along the lane (M) axis
    full_map = lambda i: (0, 0)   # weights / biases resident across the grid

    in_specs = [pl.BlockSpec((T0, TM), col_map)]
    for r in res_list:
        in_specs.append(pl.BlockSpec((r.shape[0], TM), col_map))

    flat_params = []
    for (w1, b1, w2, b2) in params:
        for p in (w1, b1, w2, b2):
            in_specs.append(pl.BlockSpec(p.shape, full_map))
            flat_params.append(p)

    out_shapes, out_specs = [], []
    for r in res_list:
        T = r.shape[0]
        out_shapes.append(jax.ShapeDtypeStruct((T, M), x0.dtype))
        out_specs.append(pl.BlockSpec((T, TM), col_map))

    # ---- advisory cost estimate so XLA overlaps the kernel with transposes --
    itemsize = jnp.dtype(x0.dtype).itemsize
    flops = 0
    transcendentals = 0
    bytes_accessed = x0.size * itemsize
    for (w1, b1, w2, b2), r in zip(params, res_list):
        t_out, t_in = w1.shape
        flops += 2 * M * t_out * (t_in + t_out)
        transcendentals += M * t_out
        bytes_accessed += (r.size + M * t_out) * itemsize
        bytes_accessed += sum(p.size * jnp.dtype(p.dtype).itemsize
                              for p in (w1, b1, w2, b2))

    # ---- explicit VMEM budget (keeps larger configs inside v7x's 64 MiB) ----
    tile_lanes = _round_up(TM, 128)
    act_tile_bytes = _round_up(T0, 8) * tile_lanes * itemsize
    for r in res_list:
        # residual input tile + output tile
        act_tile_bytes += 2 * _round_up(r.shape[0], 8) * tile_lanes * itemsize
    w_bytes = 0
    for (w1, b1, w2, b2) in params:
        for p in (w1, b1, w2, b2):
            w_bytes += (_round_up(p.shape[0], 8) * _round_up(p.shape[1], 128)
                        * jnp.dtype(p.dtype).itemsize)
    # double-buffered activation/output tiles + resident (double-buffered)
    # weights + f32 intermediates of the chain + fixed headroom
    vmem_budget = 2 * act_tile_bytes + 2 * w_bytes + 3 * act_tile_bytes
    vmem_limit = int(min(64 << 20, max(32 << 20, vmem_budget + (8 << 20))))

    outs = pl.pallas_call(
        _make_fused_kernel(n),
        out_shape=tuple(out_shapes),
        grid=grid,
        in_specs=in_specs,
        out_specs=tuple(out_specs),
        compiler_params=pltpu.CompilerParams(
            dimension_semantics=("parallel",),
            vmem_limit_bytes=vmem_limit),
        cost_estimate=pl.CostEstimate(
            flops=int(flops),
            transcendentals=int(transcendentals),
            bytes_accessed=int(bytes_accessed)),
    )(x0, *res_list, *flat_params)
    return list(outs)


# -------------------------- Module wrapper ---------------------------------

class MultiScaleTrendMixingPallas:
    """JAX/Pallas port of MultiScaleTrendMixing (deterministic synthetic init).

    param_dtype=jnp.bfloat16 halves weight DMA/residency and feeds the MXU its
    native input dtype (accumulation stays f32); default is f32 so the self-test
    matches the f32 reference to tight tolerance.
    """

    def __init__(self, seq_len, down_factor, num_reduce, key,
                 param_dtype=jnp.float32):
        self.params = []  # ordered like nn.ModuleList: coarsest->finest
        for i in reversed(range(num_reduce)):
            t_in = seq_len // down_factor ** (i + 1)
            t_out = seq_len // down_factor ** i
            key, k1, k2, k3, k4 = jax.random.split(key, 5)
            # mimic nn.Linear default init bounds (uniform +/- 1/sqrt(fan_in));
            # weights stored (out, in) == torch layout, used directly as W @ x
            s1 = 1.0 / math.sqrt(t_in)
            w1 = jax.random.uniform(k1, (t_out, t_in), jnp.float32, -s1, s1)
            b1 = jax.random.uniform(k2, (t_out, 1), jnp.float32, -s1, s1)
            s2 = 1.0 / math.sqrt(t_out)
            w2 = jax.random.uniform(k3, (t_out, t_out), jnp.float32, -s2, s2)
            b2 = jax.random.uniform(k4, (t_out, 1), jnp.float32, -s2, s2)
            self.params.append((w1.astype(param_dtype), b1,
                                w2.astype(param_dtype), b2))

    def __call__(self, trend_list):
        rev = list(trend_list)[::-1]           # coarsest first
        B, C, _ = rev[0].shape
        M = B * C

        # lane-major: time on sublanes, B*C rows on lanes
        def to_lane_major(a):
            return jnp.transpose(a, (2, 0, 1)).reshape(a.shape[2], M)

        x0 = to_lane_major(rev[0])
        res_list = [to_lane_major(r) for r in rev[1:]]

        step_outs = fused_up_sampling(x0, res_list, self.params)

        out_trend_list = [jnp.transpose(rev[0], (0, 2, 1))]
        for o in step_outs:
            T = o.shape[0]
            # (T, B*C) -> (T, B, C) -> (B, T, C): cheap leading-axis swap
            out_trend_list.append(jnp.transpose(o.reshape(T, B, C), (1, 0, 2)))
        out_trend_list.reverse()
        return out_trend_list

    # pure-JAX reference (same math, no Pallas) for correctness checking
    def reference(self, trend_list):
        rev = list(trend_list)[::-1]
        out_low = rev[0]
        out_high = rev[1]
        out_trend_list = [jnp.transpose(out_low, (0, 2, 1))]
        for i in range(len(rev) - 1):
            w1, b1, w2, b2 = self.params[i]
            h = out_low @ w1.astype(jnp.float32).T + b1[:, 0]
            g = 0.5 * h * (1.0 + lax.erf(h * _INV_SQRT2))
            res = g @ w2.astype(jnp.float32).T + b2[:, 0]
            out_high = out_high + res
            out_low = out_high
            if i + 2 <= len(rev) - 1:
                out_high = rev[i + 2]
            out_trend_list.append(jnp.transpose(out_low, (0, 2, 1)))
        out_trend_list.reverse()
        return out_trend_list


# ------------------------------ main ---------------------------------------

if __name__ == "__main__":
    B, C = 2, 4
    seq_len, down_factor, num_reduce = 16, 2, 2

    key = jax.random.PRNGKey(0)
    key, pkey = jax.random.split(key)
    module = MultiScaleTrendMixingPallas(seq_len, down_factor, num_reduce, pkey)

    # multi-scale trend inputs: (B, C, 16), (B, C, 8), (B, C, 4)
    trend_list = []
    for i in range(num_reduce + 1):
        key, sub = jax.random.split(key)
        t_i = seq_len // down_factor ** i
        trend_list.append(jax.random.normal(sub, (B, C, t_i), jnp.float32))

    outs = module(trend_list)
    outs = [jax.block_until_ready(o) for o in outs]

    refs = module.reference(trend_list)
    for o, r in zip(outs, refs):
        assert o.shape == r.shape, (o.shape, r.shape)
        assert jnp.allclose(o, r, atol=1e-4, rtol=1e-4), \
            float(jnp.max(jnp.abs(o - r)))

    print("KERNEL_OK")
</pallas_src>

<mosaic_0001>
module attributes {stable_mosaic.version = 11 : i64} {
  func.func @kernel(%arg0: i32, %arg1: memref<4x8xf32, #tpu.memory_space<vmem>>, %arg2: memref<8x8xf32, #tpu.memory_space<vmem>>, %arg3: memref<16x8xf32, #tpu.memory_space<vmem>>, %arg4: memref<8x4xf32, #tpu.memory_space<vmem>>, %arg5: memref<8x1xf32, #tpu.memory_space<vmem>>, %arg6: memref<8x8xf32, #tpu.memory_space<vmem>>, %arg7: memref<8x1xf32, #tpu.memory_space<vmem>>, %arg8: memref<16x8xf32, #tpu.memory_space<vmem>>, %arg9: memref<16x1xf32, #tpu.memory_space<vmem>>, %arg10: memref<16x16xf32, #tpu.memory_space<vmem>>, %arg11: memref<16x1xf32, #tpu.memory_space<vmem>>, %arg12: memref<8x8xf32, #tpu.memory_space<vmem>>, %arg13: memref<16x8xf32, #tpu.memory_space<vmem>>) attributes {dimension_semantics = [#tpu.dimension_semantics<parallel>], iteration_bounds = array<i64: 1>, scalar_prefetch = 0 : i64, scratch_operands = 0 : i64, tpu.core_type = #tpu.core_type<tc>, window_params = [{transform_indices = @transform_0, window_bounds = array<i64: 4, 8>}, {transform_indices = @transform_1, window_bounds = array<i64: 8, 8>}, {transform_indices = @transform_2, window_bounds = array<i64: 16, 8>}, {pipeline_mode = #tpu.pipeline_mode<synchronous>, transform_indices = @transform_3, window_bounds = array<i64: 8, 4>}, {pipeline_mode = #tpu.pipeline_mode<synchronous>, transform_indices = @transform_4, window_bounds = array<i64: 8, 1>}, {pipeline_mode = #tpu.pipeline_mode<synchronous>, transform_indices = @transform_5, window_bounds = array<i64: 8, 8>}, {pipeline_mode = #tpu.pipeline_mode<synchronous>, transform_indices = @transform_6, window_bounds = array<i64: 8, 1>}, {pipeline_mode = #tpu.pipeline_mode<synchronous>, transform_indices = @transform_7, window_bounds = array<i64: 16, 8>}, {pipeline_mode = #tpu.pipeline_mode<synchronous>, transform_indices = @transform_8, window_bounds = array<i64: 16, 1>}, {pipeline_mode = #tpu.pipeline_mode<synchronous>, transform_indices = @transform_9, window_bounds = array<i64: 16, 16>}, {pipeline_mode = #tpu.pipeline_mode<synchronous>, transform_indices = @transform_10, window_bounds = array<i64: 16, 1>}, {transform_indices = @transform_11, window_bounds = array<i64: 8, 8>}, {transform_indices = @transform_12, window_bounds = array<i64: 16, 8>}]} {
    %c0 = arith.constant 0 : index
    %c0_0 = arith.constant 0 : index
    %0 = vector.load %arg1[%c0, %c0_0] : memref<4x8xf32, #tpu.memory_space<vmem>>, vector<4x8xf32>
    %c0_1 = arith.constant 0 : index
    %c0_2 = arith.constant 0 : index
    %1 = vector.load %arg4[%c0_1, %c0_2] : memref<8x4xf32, #tpu.memory_space<vmem>>, vector<8x4xf32>
    %c0_3 = arith.constant 0 : index
    %c0_4 = arith.constant 0 : index
    %2 = vector.load %arg5[%c0_3, %c0_4] : memref<8x1xf32, #tpu.memory_space<vmem>>, vector<8x1xf32>
    %c0_5 = arith.constant 0 : index
    %c0_6 = arith.constant 0 : index
    %3 = vector.load %arg6[%c0_5, %c0_6] : memref<8x8xf32, #tpu.memory_space<vmem>>, vector<8x8xf32>
    %c0_7 = arith.constant 0 : index
    %c0_8 = arith.constant 0 : index
    %4 = vector.load %arg7[%c0_7, %c0_8] : memref<8x1xf32, #tpu.memory_space<vmem>>, vector<8x1xf32>
    %cst = arith.constant dense<0.000000e+00> : vector<8x8xf32>
    %5 = tpu.matmul %1, %0, %cst {dimension_numbers = #tpu.dot_dimension_numbers<[1], [0], [0], [1], [0, 0, 1, 1], [], []>} : vector<8x4xf32>, vector<4x8xf32>, vector<8x8xf32> -> vector<8x8xf32>
    %6 = vector.broadcast %2 : vector<8x1xf32> to vector<8x8xf32>
    %7 = arith.addf %5, %6 : vector<8x8xf32>
    %cst_9 = arith.constant 5.000000e-01 : f32
    %8 = vector.broadcast %cst_9 : f32 to vector<8x8xf32>
    %9 = arith.mulf %8, %7 : vector<8x8xf32>
    %cst_10 = arith.constant 0.707106769 : f32
    %10 = vector.broadcast %cst_10 : f32 to vector<8x8xf32>
    %11 = arith.mulf %7, %10 : vector<8x8xf32>
    %12 = math.erf %11 : vector<8x8xf32>
    %cst_11 = arith.constant 1.000000e+00 : f32
    %13 = vector.broadcast %cst_11 : f32 to vector<8x8xf32>
    %14 = arith.addf %13, %12 : vector<8x8xf32>
    %15 = arith.mulf %9, %14 : vector<8x8xf32>
    %cst_12 = arith.constant dense<0.000000e+00> : vector<8x8xf32>
    %16 = tpu.matmul %3, %15, %cst_12 {dimension_numbers = #tpu.dot_dimension_numbers<[1], [0], [0], [1], [0, 0, 1, 1], [], []>} : vector<8x8xf32>, vector<8x8xf32>, vector<8x8xf32> -> vector<8x8xf32>
    %17 = vector.broadcast %4 : vector<8x1xf32> to vector<8x8xf32>
    %18 = arith.addf %16, %17 : vector<8x8xf32>
    %c0_13 = arith.constant 0 : index
    %c0_14 = arith.constant 0 : index
    %19 = vector.load %arg2[%c0_13, %c0_14] : memref<8x8xf32, #tpu.memory_space<vmem>>, vector<8x8xf32>
    %20 = arith.addf %19, %18 : vector<8x8xf32>
    %c0_15 = arith.constant 0 : index
    %c0_16 = arith.constant 0 : index
    %21 = vector.load %arg12[%c0_15, %c0_16] : memref<8x8xf32, #tpu.memory_space<vmem>>, vector<8x8xf32>
    tpu.vector_store %arg12[%c0_15, %c0_16], %20 {strides = array<i32>} : memref<8x8xf32, #tpu.memory_space<vmem>>, vector<8x8xf32>,
    %c0_17 = arith.constant 0 : index
    %c0_18 = arith.constant 0 : index
    %22 = vector.load %arg8[%c0_17, %c0_18] : memref<16x8xf32, #tpu.memory_space<vmem>>, vector<16x8xf32>
    %c0_19 = arith.constant 0 : index
    %c0_20 = arith.constant 0 : index
    %23 = vector.load %arg9[%c0_19, %c0_20] : memref<16x1xf32, #tpu.memory_space<vmem>>, vector<16x1xf32>
    %c0_21 = arith.constant 0 : index
    %c0_22 = arith.constant 0 : index
    %24 = vector.load %arg10[%c0_21, %c0_22] : memref<16x16xf32, #tpu.memory_space<vmem>>, vector<16x16xf32>
    %c0_23 = arith.constant 0 : index
    %c0_24 = arith.constant 0 : index
    %25 = vector.load %arg11[%c0_23, %c0_24] : memref<16x1xf32, #tpu.memory_space<vmem>>, vector<16x1xf32>
    %cst_25 = arith.constant dense<0.000000e+00> : vector<16x8xf32>
    %26 = tpu.matmul %22, %20, %cst_25 {dimension_numbers = #tpu.dot_dimension_numbers<[1], [0], [0], [1], [0, 0, 1, 1], [], []>} : vector<16x8xf32>, vector<8x8xf32>, vector<16x8xf32> -> vector<16x8xf32>
    %27 = vector.broadcast %23 : vector<16x1xf32> to vector<16x8xf32>
    %28 = arith.addf %26, %27 : vector<16x8xf32>
    %cst_26 = arith.constant 5.000000e-01 : f32
    %29 = vector.broadcast %cst_26 : f32 to vector<16x8xf32>
    %30 = arith.mulf %29, %28 : vector<16x8xf32>
    %cst_27 = arith.constant 0.707106769 : f32
    %31 = vector.broadcast %cst_27 : f32 to vector<16x8xf32>
    %32 = arith.mulf %28, %31 : vector<16x8xf32>
    %33 = math.erf %32 : vector<16x8xf32>
    %cst_28 = arith.constant 1.000000e+00 : f32
    %34 = vector.broadcast %cst_28 : f32 to vector<16x8xf32>
    %35 = arith.addf %34, %33 : vector<16x8xf32>
    %36 = arith.mulf %30, %35 : vector<16x8xf32>
    %cst_29 = arith.constant dense<0.000000e+00> : vector<16x8xf32>
    %37 = tpu.matmul %24, %36, %cst_29 {dimension_numbers = #tpu.dot_dimension_numbers<[1], [0], [0], [1], [0, 0, 1, 1], [], []>} : vector<16x16xf32>, vector<16x8xf32>, vector<16x8xf32> -> vector<16x8xf32>
    %38 = vector.broadcast %25 : vector<16x1xf32> to vector<16x8xf32>
    %39 = arith.addf %37, %38 : vector<16x8xf32>
    %c0_30 = arith.constant 0 : index
    %c0_31 = arith.constant 0 : index
    %40 = vector.load %arg3[%c0_30, %c0_31] : memref<16x8xf32, #tpu.memory_space<vmem>>, vector<16x8xf32>
    %41 = arith.addf %40, %39 : vector<16x8xf32>
    %c0_32 = arith.constant 0 : index
    %c0_33 = arith.constant 0 : index
    %42 = vector.load %arg13[%c0_32, %c0_33] : memref<16x8xf32, #tpu.memory_space<vmem>>, vector<16x8xf32>
    tpu.vector_store %arg13[%c0_32, %c0_33], %41 {strides = array<i32>} : memref<16x8xf32, #tpu.memory_space<vmem>>, vector<16x8xf32>,
    return
  }
  func.func @transform_0(%arg0: i32) -> (i32, i32) {
    %c0_i32 = arith.constant 0 : i32
    %c0_i32_0 = arith.constant 0 : i32
    return %c0_i32, %arg0 : i32, i32
  }
  func.func @transform_1(%arg0: i32) -> (i32, i32) {
    %c0_i32 = arith.constant 0 : i32
    %c0_i32_0 = arith.constant 0 : i32
    return %c0_i32, %arg0 : i32, i32
  }
  func.func @transform_2(%arg0: i32) -> (i32, i32) {
    %c0_i32 = arith.constant 0 : i32
    %c0_i32_0 = arith.constant 0 : i32
    return %c0_i32, %arg0 : i32, i32
  }
  func.func @transform_3(%arg0: i32) -> (i32, i32) {
    %c0_i32 = arith.constant 0 : i32
    %c0_i32_0 = arith.constant 0 : i32
    %c0_i32_1 = arith.constant 0 : i32
    return %c0_i32, %c0_i32_0 : i32, i32
  }
  func.func @transform_4(%arg0: i32) -> (i32, i32) {
    %c0_i32 = arith.constant 0 : i32
    %c0_i32_0 = arith.constant 0 : i32
    %c0_i32_1 = arith.constant 0 : i32
    return %c0_i32, %c0_i32_0 : i32, i32
  }
  func.func @transform_5(%arg0: i32) -> (i32, i32) {
    %c0_i32 = arith.constant 0 : i32
    %c0_i32_0 = arith.constant 0 : i32
    %c0_i32_1 = arith.constant 0 : i32
    return %c0_i32, %c0_i32_0 : i32, i32
  }
  func.func @transform_6(%arg0: i32) -> (i32, i32) {
    %c0_i32 = arith.constant 0 : i32
    %c0_i32_0 = arith.constant 0 : i32
    %c0_i32_1 = arith.constant 0 : i32
    return %c0_i32, %c0_i32_0 : i32, i32
  }
  func.func @transform_7(%arg0: i32) -> (i32, i32) {
    %c0_i32 = arith.constant 0 : i32
    %c0_i32_0 = arith.constant 0 : i32
    %c0_i32_1 = arith.constant 0 : i32
    return %c0_i32, %c0_i32_0 : i32, i32
  }
  func.func @transform_8(%arg0: i32) -> (i32, i32) {
    %c0_i32 = arith.constant 0 : i32
    %c0_i32_0 = arith.constant 0 : i32
    %c0_i32_1 = arith.constant 0 : i32
    return %c0_i32, %c0_i32_0 : i32, i32
  }
  func.func @transform_9(%arg0: i32) -> (i32, i32) {
    %c0_i32 = arith.constant 0 : i32
    %c0_i32_0 = arith.constant 0 : i32
    %c0_i32_1 = arith.constant 0 : i32
    return %c0_i32, %c0_i32_0 : i32, i32
  }
  func.func @transform_10(%arg0: i32) -> (i32, i32) {
    %c0_i32 = arith.constant 0 : i32
    %c0_i32_0 = arith.constant 0 : i32
    %c0_i32_1 = arith.constant 0 : i32
    return %c0_i32, %c0_i32_0 : i32, i32
  }
  func.func @transform_11(%arg0: i32) -> (i32, i32) {
    %c0_i32 = arith.constant 0 : i32
    %c0_i32_0 = arith.constant 0 : i32
    return %c0_i32, %arg0 : i32, i32
  }
  func.func @transform_12(%arg0: i32) -> (i32, i32) {
    %c0_i32 = arith.constant 0 : i32
    %c0_i32_0 = arith.constant 0 : i32
    return %c0_i32, %arg0 : i32, i32
  }
}

</mosaic_0001>

<bundles_post_ra>
// kernel: tpu_custom_call.1
= control target key start
LH: loop header
LB: loop body
LE: loop exit
PB: predicated region body
PF: predicated region fallthrough
CT: control target
= control target key end

     0   :  { %vm55_vm0 = vcmask 1043456   ;;  %v521_v2 = vmov 0.0   ;;  %vm522_vm1 = vmmov 0   ;;  %vm51_vm2 = vcmask 31744   ;;  %s664_s0 = inlined_call_operand.vmem [shape: f32[4,8], index: 0, kind: input, shape index: {}]   ;;  %s665_s1 = inlined_call_operand.vmem [shape: f32[8,8], index: 1, kind: input, shape index: {}]   ;;  %s666_s2 = inlined_call_operand.vmem [shape: f32[16,8], index: 2, kind: input, shape index: {}]   ;;  %s667_s3 = inlined_call_operand.vmem [shape: f32[8,4], index: 3, kind: input, shape index: {}]   ;;  %s668_s4 = inlined_call_operand.vmem [shape: f32[8,1], index: 4, kind: input, shape index: {}]   ;;  %s669_s5 = inlined_call_operand.vmem [shape: f32[8,8], index: 5, kind: input, shape index: {}]   ;;  %s670_s6 = inlined_call_operand.vmem [shape: f32[8,1], index: 6, kind: input, shape index: {}]   ;;  %s671_s7 = inlined_call_operand.vmem [shape: f32[16,8], index: 7, kind: input, shape index: {}]   ;;  %s672_s8 = inlined_call_operand.vmem [shape: f32[16,1], index: 8, kind: input, shape index: {}]   ;;  %s673_s9 = inlined_call_operand.vmem [shape: f32[16,16], index: 9, kind: input, shape index: {}]   ;;  %s674_s10 = inlined_call_operand.vmem [shape: f32[16,1], index: 10, kind: input, shape index: {}]   ;;  %s675_s11 = inlined_call_operand.hbm [shape: f32[8,8], index: 11, kind: output, shape index: {0}]   ;;  %s676_s12 = inlined_call_operand.vmem [shape: f32[16,8], index: 12, kind: output, shape index: {1}]  }
   0x1   :  { %v41_v0 = vld [vmem:[%s664_s0] sm:$0xf]  ;;  %459 = vmatprep.subr.mxu0 %v521_v2  ;;  %461 = vmatprep.mubr.msk.f32.mxu0 %vm522_vm1, %v521_v2  ;;  %v523_v4 = vmov 0  }
   0x2   :  { %v42_v1 = vld [vmem:[%s667_s3] sm:$0xff]  ;;  %460 = vmatpush3.msk.msra.mxu0 %vm55_vm0, %v41_v0  ;;  %489 = vset.pattern.permute.xlu0 %v523_v4 }
   0x3   :  { %v43_v3 = vld [vmem:[%s668_s4] sm:$0xff] }
   0x4   :  { %18 = vsyncpa [#allocation3], 0  ;;  %462 = vmatmul.mubr.msk.f32.vlgmr.msra.gmra.mrb[0].mxu0 %vm51_vm2, %v42_v1  ;;  %48 = vperm.xlu0 %489, %v43_v3   ;;  %v45_v5 = vld [vmem:[%s670_s6] sm:$0xff]  ;;  %vm139_vm3 = vcmask 64512   ;;  %v219_v19 = vld [vmem:[%s672_s8 + $0x8] sm:$0xff]  ;;  %vm335_vm4 = vcmask 130048  }
   0x5   :  { %464 = vmatprep.subr.mxu1 %v521_v2  ;;  %466 = vmatprep.mubr.msk.f32.mxu1 %vm522_vm1, %v521_v2  ;;  %v222_v6 = vld [vmem:[%s674_s10] sm:$0xff]  ;;  %v223_v20 = vld [vmem:[%s674_s10 + $0x8] sm:$0xff]  ;;  %s524_s22 = smov [#allocation2]  }
   0x6   :  { %490 = vset.pattern.permute.xlu1 %v523_v4  ;;  %v44_v16 = vld [vmem:[%s669_s5] sm:$0xff]  ;;  %v217_v27 = vld [vmem:[%s671_s7 + $0x8] sm:$0xff]  ;;  %s429_s23 = sshll.u32 %s524_s22, 4  ;;  %s430_s23 = int_to_ptr.vmem [resolvable:$true] %s429_s23 }
   0x7   :  { %v216_v17 = vld [vmem:[%s671_s7] sm:$0xff]  ;;  %v221_v46 = vld [vmem:[%s673_s9 + $0x8] sm:$0xff]  ;;  %s497_s24 = scalar_lea.vmem %s430_s23, 128  ;;  %p502_p1 = scmp.lt.s32.totalorder %s430_s23, %s430_s23 }
   0x8   :  { %136 = vperm.xlu0 %489, %v45_v5   ;;  %471 = vmatprep.mubr.msk.f32.mxu0 %vm139_vm3, %v216_v17  ;;  %v218_v18 = vld [vmem:[%s672_s8] sm:$0xff]  ;;  %p498_p0 = scmp.ne.s32.totalorder %s430_s23, %s497_s24  ;;  %p503_p2 = scmp.lt.s32.totalorder %s497_s24, %s497_s24 }
   0x9   :  { %226 = vperm.xlu1 %490, %v218_v18   ;;  %v213_v23 = vld [vmem:[%s665_s1] sm:$0xff] }
   0xa   :  { %v220_v28 = vld [vmem:[%s673_s9] sm:$0xff]  ;;  %p504_p3 = por %p503_p2, %p502_p1 }
   0xc   :  { %327 = vperm.xlu0 %489, %v222_v6   ;;  %p505_p4 = pnand %p504_p3, %p498_p0 }
   0xd   :  { %231 = vperm.xlu1 %490, %v219_v19  }
  0x11   :  { %332 = vperm.xlu1 %490, %v223_v20  }
  0x83   :  { %v49_v7 = vpop.permute.xlu0 %48 }
  0x87   :  { %v137_v21 = vpop.permute.xlu0 %136 }
  0x88   :  { %v227_v29 = vpop.permute.xlu1 %226 }
  0x8c   :  { %v232_v30 = vpop.permute.xlu1 %231 }
  0xd7   :  { %v125_v8 = vpop.f32.mrb[0].mxu0 }
  0xd8   :  { %v126_v9 = vadd.f32 %v125_v8, %v49_v7  ;;  %v463_v10 = vpop.f32.mrb[1].mxu0 }
  0xda   :  { %v130_v11 = vmul.f32 0.70710677, %v126_v9  ;;  %v129_v13 = vmul.f32 0.5, %v126_v9 }
  0xdc   :  { %491 = verf.f32 %v130_v11 }
  0xe6   :  { %v492_v12 = vpop.eup %491 }
  0xe7   :  { %v132_v14 = vadd.f32 1.0, %v492_v12 }
  0xe9   :  { %v133_v15 = vmul.f32 %v132_v14, %v129_v13 }
  0xeb   :  { %465 = vmatpush3.msra.mxu1 %v133_v15 }
  0xec   :  { %467 = vmatmul.mubr.msk.f32.vlgmr.msra.gmra.mrb[0].mxu1 %vm139_vm3, %v44_v16 }
  0xed   :  { %478 = vmatprep.mubr.msk.f32.mxu1 %vm335_vm4, %v220_v28 }
 0x1bf   :  { %v209_v22 = vpop.f32.mrb[0].mxu1 }
 0x1c0   :  { %v210_v24 = vadd.f32 %v209_v22, %v137_v21  ;;  %v468_v25 = vpop.f32.mrb[1].mxu1 }
 0x1c2   :  { %v214_v26 = vadd.f32 %v213_v23, %v210_v24 }
 0x1c4   :  { %215 = vst.msk [vmem:[#allocation2] sm:$0xff] %vm139_vm3, %v214_v26  ;;  %469 = vmatprep.subr.mxu0 %v214_v26 }
 0x1c5   :  { %470 = vmatpush3.msra.mxu0 %v214_v26 }
 0x1c6   :  { %472 = vmatmul.mubr.msk.f32.vlgmr.msra.gmra.mrb[2].mxu0 %vm139_vm3, %v217_v27 }
 0x299   :  { %v473_v31 = vpop.f32.mrb[2].mxu0 }
 0x29a   :  { %v312_v32 = vadd.f32 %v473_v31, %v232_v30  ;;  %v306_v33 = vpop.f32.mrb[3].mxu0 }
 0x29b   :  { %v307_v34 = vadd.f32 %v306_v33, %v227_v29 }
 0x29c   :  { %v318_v35 = vmul.f32 0.70710677, %v312_v32  ;;  %v316_v39 = vmul.f32 0.5, %v312_v32 }
 0x29d   :  { %v317_v36 = vmul.f32 0.70710677, %v307_v34  ;;  %v315_v41 = vmul.f32 0.5, %v307_v34 }
 0x29e   :  { %493 = verf.f32 %v318_v35 }
 0x29f   :  { %495 = verf.f32 %v317_v36 }
 0x2a8   :  { %v494_v37 = vpop.eup %493 }
 0x2a9   :  { %v496_v38 = vpop.eup %495  ;;  %v322_v40 = vadd.f32 1.0, %v494_v37 }
 0x2aa   :  { %v321_v42 = vadd.f32 1.0, %v496_v38 }
 0x2ab   :  { %v324_v43 = vmul.f32 %v322_v40, %v316_v39 }
 0x2ac   :  { %v323_v44 = vmul.f32 %v321_v42, %v315_v41 }
 0x2ae   :  { %v481_v45 = vpack.c.bf16 %v324_v43, %v323_v44 }
 0x2b0   :  { %482 = vmatprep.subr.bf16.mxu1 %v481_v45 }
 0x2b1   :  { %484 = vmatpush3.bf16.msra.mxu1 %v481_v45 }
 0x2b4   :  { %479 = vmatmul.mubr.msk.f32.vlgmr.msra.gmra.mrb[2].mxu1 %vm335_vm4, %v221_v46 }
 0x2b5   :  { %508 = shalt.err (!%p505_p4)
}
 0x2b6   :  { %s509_s0 = scalar_lea.hbm %s675_s11, 128 }
 0x2b7   :  { %p510_p5 = scmp.ne.s32.totalorder %s675_s11, %s509_s0  ;;  %p513_p6 = scmp.lt.u32.totalorder %s509_s0, %s675_s11 }
 0x2b9   :  { %p515_p7 = pnand %p513_p6, %p510_p5 }
 0x2bb   :  { %518 = shalt.err (!%p515_p7)
}
 0x2bc   :  { %432 = dma.vmem_to_hbm [thread:$0]  %s430_s23, 128, %s675_s11, [#allocation3]   ;;  %v333_v47 = vpop.permute.xlu1 %332  ;;  %v418_v49 = vld [vmem:[%s666_s2 + $0x8] sm:$0xff]  ;;  %v328_v50 = vpop.permute.xlu0 %327  ;;  %v417_v53 = vld [vmem:[%s666_s2] sm:$0xff] }
 0x387   :  { %v480_v48 = vpop.f32.mrb[2].mxu1 }
 0x388   :  { %v414_v51 = vadd.f32 %v480_v48, %v333_v47  ;;  %v408_v52 = vpop.f32.mrb[3].mxu1 }
 0x389   :  { %v409_v54 = vadd.f32 %v408_v52, %v328_v50 }
 0x38a   :  { %v420_v55 = vadd.f32 %v418_v49, %v414_v51 }
 0x38b   :  { %v419_v56 = vadd.f32 %v417_v53, %v409_v54 }
 0x38c   :  { %422 = vst.msk [vmem:[%s676_s12 + $0x8] sm:$0xff] %vm139_vm3, %v420_v55 }
 0x38d   :  { %421 = vst.msk [vmem:[%s676_s12] sm:$0xff] %vm139_vm3, %v419_v56 }
 0x38e   :  { %519 = dma.done.wait [#allocation3], 128  }
 0x38f   :  { %520 = vsyncadd [#allocation3], 4294967168 }
 0x390   :  { %440 = vsyncpa [#allocation3], 1 }

</bundles_post_ra>
